<compile_context>
chip_gen: v7x
topology: tpu7x:2x2x1
jax: 0.10.0
libtpu: 0.0.40
codegen_flags: <defaults>
</compile_context>

<pallas_src>
import jax
import jax.numpy as jnp
from jax.experimental import pallas as pl
from jax.experimental.pallas import tpu as pltpu

_LANES = 128            # vreg lane width
_SUBLANES = 8           # vreg sublane count (f32)
_MAX_TILE_ROWS = 8192   # (8192, 128) f32 = 4 MiB per buffer
_MIN_GRID_STEPS = 4     # keep >=4 balanced steps so v7x's 2 TensorCores both get work
_SMALL_N_ELEMS = 64 * 1024  # below this, plain XLA a + b*x wins over a pallas_call


def _round_up(x, m):
    return (x + m - 1) // m * m


def _linreg_kernel(a_ref, b_ref, x_ref, o_ref):
    # a_ref / b_ref: (1, 1) scalars in SMEM; x_ref / o_ref: (tile_rows, 128) VMEM tiles.
    a = a_ref[0, 0]
    b = b_ref[0, 0]
    o_ref[...] = a + b * x_ref[...]


def manual_linear_regression(x, a, b, *, min_pallas_elems=_SMALL_N_ELEMS):
    """y = a + b * x, elementwise. x: any-shape f32, a/b: scalar f32."""
    orig_shape = x.shape
    x = jnp.asarray(x, jnp.float32)
    a = jnp.asarray(a, jnp.float32).reshape(())
    b = jnp.asarray(b, jnp.float32).reshape(())
    n = x.size

    # ---- Small-N fast path: launch/repack overhead dominates, use fused XLA ----
    if n < min_pallas_elems:
        return (a + b * x).reshape(orig_shape)

    # ---- Repack into a lane-dense (rows, 128) slab; pad at most 1023 elems ----
    flat = x.reshape(-1)
    rows = _round_up(max(_SUBLANES, pl.cdiv(n, _LANES)), _SUBLANES)
    padded = rows * _LANES
    if padded != n:
        flat = jnp.pad(flat, (0, padded - n))
    slab = flat.reshape(rows, _LANES)

    # ---- Balanced row tiles; partial last block (if any) is masked by Pallas ----
    if rows >= _MIN_GRID_STEPS * _SUBLANES:
        num_steps = max(pl.cdiv(rows, _MAX_TILE_ROWS), _MIN_GRID_STEPS)
    else:
        num_steps = pl.cdiv(rows, _MAX_TILE_ROWS)
    tile_rows = _round_up(pl.cdiv(rows, num_steps), _SUBLANES)
    grid = (pl.cdiv(rows, tile_rows),)

    a2 = a.reshape(1, 1)
    b2 = b.reshape(1, 1)

    out_slab = pl.pallas_call(
        _linreg_kernel,
        out_shape=jax.ShapeDtypeStruct((rows, _LANES), jnp.float32),
        grid=grid,
        in_specs=[
            pl.BlockSpec((1, 1), lambda i: (0, 0), memory_space=pltpu.SMEM),  # a
            pl.BlockSpec((1, 1), lambda i: (0, 0), memory_space=pltpu.SMEM),  # b
            pl.BlockSpec((tile_rows, _LANES), lambda i: (i, 0)),              # x tile
        ],
        out_specs=pl.BlockSpec((tile_rows, _LANES), lambda i: (i, 0)),
        input_output_aliases={2: 0},  # write in place over the wrapper-created slab
        compiler_params=pltpu.CompilerParams(
            dimension_semantics=("parallel",),       # shard grid across TCs (v7x 2x)
            vmem_limit_bytes=32 * 1024 * 1024,       # explicit; safe on 64 MiB v7x
        ),
    )(a2, b2, slab)

    # ---- Strip padding and restore the original layout ----------------------
    return out_slab.reshape(-1)[:n].reshape(orig_shape)


if __name__ == "__main__":
    key = jax.random.PRNGKey(0)
    kx, ka, kb = jax.random.split(key, 3)

    # Small shape consistent with the module's usage: x ~ (100, 1)
    x = jax.random.uniform(kx, (100, 1), dtype=jnp.float32)
    # Deterministic "randn" parameter init (scalar a, scalar b)
    a = jax.random.normal(ka, (1,), dtype=jnp.float32)[0]
    b = jax.random.normal(kb, (1,), dtype=jnp.float32)[0]

    y_ref = a + b * x

    # 1) Default path at N=100 takes the small-N fast path (no pallas launch).
    y_fast = manual_linear_regression(x, a, b)
    jax.block_until_ready(y_fast)
    assert y_fast.shape == x.shape and y_fast.dtype == jnp.float32
    assert jnp.allclose(y_fast, y_ref, atol=1e-6, rtol=1e-6)

    # 2) Force the Pallas kernel at the same small shape (single (8,128) block).
    y_kern = manual_linear_regression(x, a, b, min_pallas_elems=0)
    jax.block_until_ready(y_kern)
    assert y_kern.shape == x.shape and y_kern.dtype == jnp.float32
    assert jnp.allclose(y_kern, y_ref, atol=1e-6, rtol=1e-6)

    # 3) Larger input exercising the balanced multi-step grid with a masked
    #    partial last block (300000 elems -> 2344 rows, 4 steps of ~586 rows).
    x_big = jax.random.uniform(kx, (300_000, 1), dtype=jnp.float32)
    y_big = manual_linear_regression(x_big, a, b)
    jax.block_until_ready(y_big)
    assert jnp.allclose(y_big, a + b * x_big, atol=1e-6, rtol=1e-6)

    print("KERNEL_OK")
</pallas_src>

<mosaic_0001>
module attributes {stable_mosaic.version = 11 : i64} {
  func.func @_linreg_kernel(%arg0: i32, %arg1: memref<1x1xf32, #tpu.memory_space<smem>>, %arg2: memref<1x1xf32, #tpu.memory_space<smem>>, %arg3: memref<8x128xf32, #tpu.memory_space<vmem>>, %arg4: memref<8x128xf32, #tpu.memory_space<vmem>>) attributes {dimension_semantics = [#tpu.dimension_semantics<parallel>], iteration_bounds = array<i64: 1>, scalar_prefetch = 0 : i64, scratch_operands = 0 : i64, tpu.core_type = #tpu.core_type<tc>, window_params = [{transform_indices = @transform_0, window_bounds = array<i64: 1, 1>}, {transform_indices = @transform_1, window_bounds = array<i64: 1, 1>}, {transform_indices = @transform_2, window_bounds = array<i64: 8, 128>}, {transform_indices = @transform_3, window_bounds = array<i64: 8, 128>}]} {
    %c0 = arith.constant 0 : index
    %c0_0 = arith.constant 0 : index
    %0 = memref.load %arg1[%c0, %c0_0] : memref<1x1xf32, #tpu.memory_space<smem>>
    %c0_1 = arith.constant 0 : index
    %c0_2 = arith.constant 0 : index
    %1 = memref.load %arg2[%c0_1, %c0_2] : memref<1x1xf32, #tpu.memory_space<smem>>
    %c0_3 = arith.constant 0 : index
    %c0_4 = arith.constant 0 : index
    %2 = vector.load %arg3[%c0_3, %c0_4] : memref<8x128xf32, #tpu.memory_space<vmem>>, vector<8x128xf32>
    %3 = vector.broadcast %1 : f32 to vector<8x128xf32>
    %4 = arith.mulf %3, %2 : vector<8x128xf32>
    %5 = vector.broadcast %0 : f32 to vector<8x128xf32>
    %6 = arith.addf %5, %4 : vector<8x128xf32>
    %c0_5 = arith.constant 0 : index
    %c0_6 = arith.constant 0 : index
    %7 = vector.load %arg4[%c0_5, %c0_6] : memref<8x128xf32, #tpu.memory_space<vmem>>, vector<8x128xf32>
    tpu.vector_store %arg4[%c0_5, %c0_6], %6 {strides = array<i32>} : memref<8x128xf32, #tpu.memory_space<vmem>>, vector<8x128xf32>,
    return
  }
  func.func @transform_0(%arg0: i32) -> (i32, i32) {
    %c0_i32 = arith.constant 0 : i32
    %c0_i32_0 = arith.constant 0 : i32
    %c0_i32_1 = arith.constant 0 : i32
    return %c0_i32, %c0_i32_0 : i32, i32
  }
  func.func @transform_1(%arg0: i32) -> (i32, i32) {
    %c0_i32 = arith.constant 0 : i32
    %c0_i32_0 = arith.constant 0 : i32
    %c0_i32_1 = arith.constant 0 : i32
    return %c0_i32, %c0_i32_0 : i32, i32
  }
  func.func @transform_2(%arg0: i32) -> (i32, i32) {
    %c0_i32 = arith.constant 0 : i32
    %c0_i32_0 = arith.constant 0 : i32
    return %arg0, %c0_i32 : i32, i32
  }
  func.func @transform_3(%arg0: i32) -> (i32, i32) {
    %c0_i32 = arith.constant 0 : i32
    %c0_i32_0 = arith.constant 0 : i32
    return %arg0, %c0_i32 : i32, i32
  }
}

</mosaic_0001>

<bundles_post_ra>
// kernel: tpu_custom_call.1
= control target key start
LH: loop header
LB: loop body
LE: loop exit
PB: predicated region body
PF: predicated region fallthrough
CT: control target
= control target key end

     0   :  { %10 = vsyncpa [#allocation5], 0  ;;  %s154_s0 = inlined_call_operand.<no memory space> [shape: f32[1,1], index: 0, kind: input, shape index: {}]   ;;  %s155_s1 = inlined_call_operand.<no memory space> [shape: f32[1,1], index: 1, kind: input, shape index: {}]   ;;  %s156_s2 = inlined_call_operand.hbm [shape: f32[8,128], index: 2, kind: input, shape index: {}, may-alias: {2,3}]   ;;  %s157_s3 = inlined_call_operand.hbm [shape: f32[8,128], index: 3, kind: output, shape index: {}, may-alias: {2,3}]  }
   0x1   :  { %11 = vsyncpa [#allocation6], 0  ;;  %s102_s12 = smov [#allocation4]   ;;  %s54_s16 = scalar_lea.hbm %s156_s2, 128 }
   0x2   :  { %s22_s13 = sshll.u32 %s102_s12, 4  ;;  %p55_p0 = scmp.ne.s32.totalorder %s156_s2, %s54_s16  ;;  %s23_s13 = int_to_ptr.vmem [resolvable:$true] %s22_s13 }
   0x3   :  { %p58_p1 = scmp.lt.u32.totalorder %s54_s16, %s156_s2 }
   0x5   :  { %p60_p2 = pnand %p58_p1, %p55_p0 }
   0x7   :  { %63 = shalt.err (!%p60_p2)
}
   0x8   :  { %s64_s21 = scalar_lea.vmem %s23_s13, 128  ;;  %p69_p4 = scmp.lt.s32.totalorder %s23_s13, %s23_s13 }
   0x9   :  { %p65_p3 = scmp.ne.s32.totalorder %s23_s13, %s64_s21  ;;  %p70_p5 = scmp.lt.s32.totalorder %s64_s21, %s64_s21 }
   0xb   :  { %p71_p6 = por %p70_p5, %p69_p4 }
   0xd   :  { %p72_p7 = pnand %p71_p6, %p65_p3 }
   0xf   :  { %75 = shalt.err (!%p72_p7)
}
  0x10   :  { %25 = dma.hbm_to_vmem [thread:$0]  %s156_s2, 128, %s23_s13, [#allocation5]  }
  0x11   :  { %98 = dma.done.wait [#allocation5], 128  }
  0x12   :  { %99 = vsyncadd [#allocation5], 4294967168  ;;  %v32_v0 = vstv %s155_s1  ;;  %v31_v1 = vld [vmem:[#allocation4] sm:$0xff]  ;;  %v34_v2 = vstv %s154_s0  ;;  %s103_s28 = smov [#allocation7]  }
  0x13   :  { %s43_s29 = sshll.u32 %s103_s28, 4  ;;  %v33_v3 = vmul.f32 %v32_v0, %v31_v1  ;;  %s44_s29 = int_to_ptr.vmem [resolvable:$true] %s43_s29 }
  0x14   :  { %s76_s30 = scalar_lea.vmem %s44_s29, 128  ;;  %p81_p9 = scmp.lt.s32.totalorder %s44_s29, %s44_s29 }
  0x15   :  { %v35_v4 = vadd.f32 %v34_v2, %v33_v3  ;;  %p77_p8 = scmp.ne.s32.totalorder %s44_s29, %s76_s30  ;;  %p82_p10 = scmp.lt.s32.totalorder %s76_s30, %s76_s30 }
  0x17   :  { %36 = vst [vmem:[#allocation7] sm:$0xff] %v35_v4  ;;  %p83_p11 = por %p82_p10, %p81_p9 }
  0x19   :  { %p84_p12 = pnand %p83_p11, %p77_p8 }
  0x1b   :  { %87 = shalt.err (!%p84_p12)
}
  0x1c   :  { %s88_s4 = scalar_lea.hbm %s157_s3, 128 }
  0x1d   :  { %p89_p13 = scmp.ne.s32.totalorder %s157_s3, %s88_s4  ;;  %p92_p0 = scmp.lt.u32.totalorder %s88_s4, %s157_s3 }
  0x1f   :  { %p94_p1 = pnand %p92_p0, %p89_p13 }
  0x21   :  { %97 = shalt.err (!%p94_p1)
}
  0x22   :  { %46 = dma.vmem_to_hbm [thread:$0]  %s44_s29, 128, %s157_s3, [#allocation6]  }
  0x23   :  { %100 = dma.done.wait [#allocation6], 128  }
  0x24   :  { %101 = vsyncadd [#allocation6], 4294967168 }
  0x25   :  { %50 = vsyncpa [#allocation5], 1 }
  0x26   :  { %51 = vsyncpa [#allocation6], 1 }

</bundles_post_ra>
